<compile_context>
chip_gen: v5e
topology: v5e:2x2
jax: 0.10.0
libtpu: 0.0.40
codegen_flags: <defaults>
</compile_context>

<pallas_src>
import functools

import numpy as np

import jax
import jax.numpy as jnp
from jax.experimental import pallas as pl
from jax.experimental.pallas import tpu as pltpu


def _round_up(n, m):
    return ((n + m - 1) // m) * m


def _mlp_skip_kernel(hid, x_ref, w1s_ref, b1s_ref, w2_ref, b2_ref, w3_ref, o_ref):
    x = x_ref[...]

    # Fused fc1 + skip: one MXU pass of x against [w1 | w_skip].  The bias slab
    # is [b1 | (b3 + b_skip)], so the skip lanes already carry the final bias.
    # f32 accumulation; bias add / ReLU stay in f32 (v5e-safe).
    h1s = jnp.dot(x, w1s_ref[...], preferred_element_type=jnp.float32) + b1s_ref[...]
    h1 = jnp.maximum(h1s[:, :hid], 0.0)   # fc1 lanes -> ReLU
    skip = h1s[:, hid:]                    # skip lanes (x @ ws + bs + b3), no ReLU

    # fc2 -> ReLU
    h2 = jnp.dot(h1.astype(w2_ref.dtype), w2_ref[...],
                 preferred_element_type=jnp.float32) + b2_ref[...]
    h2 = jnp.maximum(h2, 0.0)

    # fc3 (its bias is already folded into `skip`) + skip, sigmoid (EUP), store.
    out = jnp.dot(h2.astype(w3_ref.dtype), w3_ref[...],
                  preferred_element_type=jnp.float32) + skip
    o_ref[...] = jax.nn.sigmoid(out).astype(o_ref.dtype)


@functools.partial(jax.jit,
                   static_argnames=("block_b", "operand_dtype", "out_dtype"))
def three_layer_nn_with_skip(x, params, block_b=None,
                             operand_dtype=jnp.bfloat16, out_dtype=None):
    """x: [B, input_size]. params: dict of transposed weights / 2-D biases."""
    B, in_dim = x.shape
    hid = params["w1"].shape[1]
    out_dim = params["w3"].shape[1]

    # Output dtype defaults to the caller's (pre-cast) x dtype so module
    # semantics (f32 in -> f32 out) are preserved; pass out_dtype=jnp.bfloat16
    # to also halve the O(B) output HBM stream.
    if out_dtype is None:
        out_dtype = x.dtype

    # Fold the skip projection and the fc3 bias into the fc1 slab (O(1) work,
    # done once at trace time; no per-step activation concat needed).
    w1s = jnp.concatenate([params["w1"], params["ws"]], axis=1)          # [in, hid+out]
    b1s = jnp.concatenate([params["b1"], params["b3"] + params["bs"]], axis=1)  # [1, hid+out]
    w2, b2, w3 = params["w2"], params["b2"], params["w3"]

    if operand_dtype is not None:
        # bf16 operands by default.  NOTE: if x arrives as f32 this cast is one
        # extra (read-f32 / write-bf16) XLA pass over x; callers wanting the
        # full bandwidth win should hand x over already in operand_dtype.
        # Biases stay f32; all elementwise math inside the kernel stays f32.
        w1s = w1s.astype(operand_dtype)
        w2 = w2.astype(operand_dtype)
        w3 = w3.astype(operand_dtype)
        if x.dtype != operand_dtype:
            x = x.astype(operand_dtype)

    if block_b is None:
        if B <= 4096:
            block_b = B   # single step; nothing to amortise or shard
        else:
            # >= 4096 rows/step amortises the ~0.35 us per-step overhead,
            # <= 8192 keeps the lane-padded, double-buffered tiles well inside
            # v7x's 64 MiB VMEM, and cdiv(B, 8) keeps >= 8 grid steps at large
            # B so v7x megacore can split the "parallel" axis.
            block_b = _round_up(min(8192, max(4096, pl.cdiv(B, 8))), 16)
    grid = (pl.cdiv(B, block_b),)

    # Narrow (< 128-lane) blocks are lane-padded to 128 lanes in VMEM: budget
    # the padded, double-buffered x + out footprint plus headroom, raise v5e's
    # 16 MiB scoped default, and stay under v7x's 64 MiB physical VMEM.
    def _pad_bytes(dt):
        return block_b * 128 * np.dtype(dt).itemsize
    vmem_limit = int(min(60 * 2**20,
                         max(32 * 2**20,
                             2 * (_pad_bytes(x.dtype) + _pad_bytes(out_dtype))
                             + (16 << 20))))

    def rep(shape):
        # Whole (tiny) tensor with a constant index_map: the pipeline DMAs it
        # once and re-uses the buffer on every step.  (pl.Buffered(1) would
        # drop its second buffer too, but that saves only a few KiB next to the
        # MiB-scale x/out tiles, so it is not worth the extra plumbing.)
        return pl.BlockSpec(shape, lambda i: (0,) * len(shape))

    return pl.pallas_call(
        functools.partial(_mlp_skip_kernel, hid),
        out_shape=jax.ShapeDtypeStruct((B, out_dim), out_dtype),
        grid=grid,
        in_specs=[
            pl.BlockSpec((block_b, in_dim), lambda i: (i, 0)),  # x tile (streamed)
            rep((in_dim, hid + out_dim)),   # [w1 | w_skip]
            rep((1, hid + out_dim)),        # [b1 | b3 + b_skip]
            rep((hid, hid)),                # w2
            rep((1, hid)),                  # b2
            rep((hid, out_dim)),            # w3
        ],
        out_specs=pl.BlockSpec((block_b, out_dim), lambda i: (i, 0)),
        compiler_params=pltpu.CompilerParams(
            dimension_semantics=("parallel",),
            vmem_limit_bytes=vmem_limit),
    )(x, w1s, b1s, w2, b2, w3)


def init_params(key, input_size, hidden_size, output_size, dtype=jnp.float32):
    """Deterministic init mimicking nn.Linear (uniform +/- 1/sqrt(fan_in)),
    weights stored as [in_features, out_features]."""
    ks = jax.random.split(key, 8)

    def lin(kw, kb, fan_in, fan_out):
        bound = 1.0 / jnp.sqrt(fan_in)
        w = jax.random.uniform(kw, (fan_in, fan_out), dtype, -bound, bound)
        b = jax.random.uniform(kb, (1, fan_out), dtype, -bound, bound)
        return w, b

    w1, b1 = lin(ks[0], ks[1], input_size, hidden_size)
    w2, b2 = lin(ks[2], ks[3], hidden_size, hidden_size)
    w3, b3 = lin(ks[4], ks[5], hidden_size, output_size)
    ws, bs = lin(ks[6], ks[7], input_size, output_size)
    return dict(w1=w1, b1=b1, w2=w2, b2=b2, w3=w3, b3=b3, ws=ws, bs=bs)


def _reference(x, p):
    h1 = jnp.maximum(x @ p["w1"] + p["b1"], 0.0)
    h2 = jnp.maximum(h1 @ p["w2"] + p["b2"], 0.0)
    out = h2 @ p["w3"] + p["b3"] + x @ p["ws"] + p["bs"]
    return jax.nn.sigmoid(out)


if __name__ == "__main__":
    key = jax.random.PRNGKey(0)
    kx, kp = jax.random.split(key)

    B, input_size, hidden_size, output_size = 2, 16, 32, 8
    x = jax.random.normal(kx, (B, input_size), dtype=jnp.float32)
    params = init_params(kp, input_size, hidden_size, output_size)
    ref = _reference(x, params)

    # Exact-ish check on the all-f32 path.
    out_f32 = jax.block_until_ready(
        three_layer_nn_with_skip(x, params, operand_dtype=jnp.float32))
    assert out_f32.shape == (B, output_size)
    assert jnp.allclose(out_f32, ref, atol=1e-5, rtol=1e-5)

    # Default path (bf16 operands, f32 output); looser tolerance.
    out_def = jax.block_until_ready(three_layer_nn_with_skip(x, params))
    assert jnp.allclose(out_def, ref, atol=5e-2, rtol=5e-2)

    # Larger batch: multi-step grid, partial final tile, bf16 output stream.
    B2 = 4096 + 40
    x2 = jax.random.normal(kx, (B2, input_size), dtype=jnp.float32)
    ref2 = _reference(x2, params)
    out_bf16 = jax.block_until_ready(
        three_layer_nn_with_skip(x2, params, out_dtype=jnp.bfloat16))
    assert out_bf16.dtype == jnp.bfloat16
    assert jnp.allclose(out_bf16.astype(jnp.float32), ref2, atol=5e-2, rtol=5e-2)

    # f32 path on an explicitly tiled grid with a partial last tile.
    out_tiled = jax.block_until_ready(
        three_layer_nn_with_skip(x2, params, block_b=1024,
                                 operand_dtype=jnp.float32))
    assert jnp.allclose(out_tiled, ref2, atol=1e-5, rtol=1e-5)

    print("KERNEL_OK")
</pallas_src>

<mosaic_0001>
module attributes {stable_mosaic.version = 11 : i64} {
  func.func @_mlp_skip_kernel(%arg0: i32, %arg1: memref<2x16xf32, #tpu.memory_space<vmem>>, %arg2: memref<16x40xf32, #tpu.memory_space<vmem>>, %arg3: memref<1x40xf32, #tpu.memory_space<vmem>>, %arg4: memref<32x32xf32, #tpu.memory_space<vmem>>, %arg5: memref<1x32xf32, #tpu.memory_space<vmem>>, %arg6: memref<32x8xf32, #tpu.memory_space<vmem>>, %arg7: memref<2x8xf32, #tpu.memory_space<vmem>>) attributes {dimension_semantics = [#tpu.dimension_semantics<parallel>], iteration_bounds = array<i64: 1>, scalar_prefetch = 0 : i64, scratch_operands = 0 : i64, tpu.core_type = #tpu.core_type<tc>, window_params = [{transform_indices = @transform_0, window_bounds = array<i64: 2, 16>}, {pipeline_mode = #tpu.pipeline_mode<synchronous>, transform_indices = @transform_1, window_bounds = array<i64: 16, 40>}, {pipeline_mode = #tpu.pipeline_mode<synchronous>, transform_indices = @transform_2, window_bounds = array<i64: 1, 40>}, {pipeline_mode = #tpu.pipeline_mode<synchronous>, transform_indices = @transform_3, window_bounds = array<i64: 32, 32>}, {pipeline_mode = #tpu.pipeline_mode<synchronous>, transform_indices = @transform_4, window_bounds = array<i64: 1, 32>}, {pipeline_mode = #tpu.pipeline_mode<synchronous>, transform_indices = @transform_5, window_bounds = array<i64: 32, 8>}, {transform_indices = @transform_6, window_bounds = array<i64: 2, 8>}]} {
    %c0 = arith.constant 0 : index
    %c0_0 = arith.constant 0 : index
    %0 = vector.load %arg1[%c0, %c0_0] : memref<2x16xf32, #tpu.memory_space<vmem>>, vector<2x16xf32>
    %c0_1 = arith.constant 0 : index
    %c0_2 = arith.constant 0 : index
    %1 = vector.load %arg2[%c0_1, %c0_2] : memref<16x40xf32, #tpu.memory_space<vmem>>, vector<16x40xf32>
    %cst = arith.constant dense<0.000000e+00> : vector<2x40xf32>
    %2 = tpu.matmul %0, %1, %cst {dimension_numbers = #tpu.dot_dimension_numbers<[1], [0], [0], [1], [0, 0, 1, 1], [], []>} : vector<2x16xf32>, vector<16x40xf32>, vector<2x40xf32> -> vector<2x40xf32>
    %c0_3 = arith.constant 0 : index
    %c0_4 = arith.constant 0 : index
    %3 = vector.load %arg3[%c0_3, %c0_4] : memref<1x40xf32, #tpu.memory_space<vmem>>, vector<1x40xf32>
    %4 = vector.broadcast %3 : vector<1x40xf32> to vector<2x40xf32>
    %5 = arith.addf %2, %4 : vector<2x40xf32>
    %6 = vector.extract_strided_slice %5 {offsets = [0, 0], sizes = [2, 32], strides = [1, 1]} : vector<2x40xf32> to vector<2x32xf32>
    %cst_5 = arith.constant 0.000000e+00 : f32
    %7 = vector.broadcast %cst_5 : f32 to vector<2x32xf32>
    %8 = arith.maximumf %6, %7 : vector<2x32xf32>
    %9 = vector.extract_strided_slice %5 {offsets = [0, 32], sizes = [2, 8], strides = [1, 1]} : vector<2x40xf32> to vector<2x8xf32>
    %c0_6 = arith.constant 0 : index
    %c0_7 = arith.constant 0 : index
    %10 = vector.load %arg4[%c0_6, %c0_7] : memref<32x32xf32, #tpu.memory_space<vmem>>, vector<32x32xf32>
    %cst_8 = arith.constant dense<0.000000e+00> : vector<2x32xf32>
    %11 = tpu.matmul %8, %10, %cst_8 {dimension_numbers = #tpu.dot_dimension_numbers<[1], [0], [0], [1], [0, 0, 1, 1], [], []>} : vector<2x32xf32>, vector<32x32xf32>, vector<2x32xf32> -> vector<2x32xf32>
    %c0_9 = arith.constant 0 : index
    %c0_10 = arith.constant 0 : index
    %12 = vector.load %arg5[%c0_9, %c0_10] : memref<1x32xf32, #tpu.memory_space<vmem>>, vector<1x32xf32>
    %13 = vector.broadcast %12 : vector<1x32xf32> to vector<2x32xf32>
    %14 = arith.addf %11, %13 : vector<2x32xf32>
    %cst_11 = arith.constant 0.000000e+00 : f32
    %15 = vector.broadcast %cst_11 : f32 to vector<2x32xf32>
    %16 = arith.maximumf %14, %15 : vector<2x32xf32>
    %c0_12 = arith.constant 0 : index
    %c0_13 = arith.constant 0 : index
    %17 = vector.load %arg6[%c0_12, %c0_13] : memref<32x8xf32, #tpu.memory_space<vmem>>, vector<32x8xf32>
    %cst_14 = arith.constant dense<0.000000e+00> : vector<2x8xf32>
    %18 = tpu.matmul %16, %17, %cst_14 {dimension_numbers = #tpu.dot_dimension_numbers<[1], [0], [0], [1], [0, 0, 1, 1], [], []>} : vector<2x32xf32>, vector<32x8xf32>, vector<2x8xf32> -> vector<2x8xf32>
    %19 = arith.addf %18, %9 : vector<2x8xf32>
    %20 = arith.negf %19 : vector<2x8xf32>
    %21 = math.exp %20 : vector<2x8xf32>
    %cst_15 = arith.constant 1.000000e+00 : f32
    %22 = vector.broadcast %cst_15 : f32 to vector<2x8xf32>
    %23 = arith.addf %22, %21 : vector<2x8xf32>
    %24 = arith.divf %22, %23 : vector<2x8xf32>
    %c0_16 = arith.constant 0 : index
    %c0_17 = arith.constant 0 : index
    %25 = vector.load %arg7[%c0_16, %c0_17] : memref<2x8xf32, #tpu.memory_space<vmem>>, vector<2x8xf32>
    tpu.vector_store %arg7[%c0_16, %c0_17], %24 {strides = array<i32>} : memref<2x8xf32, #tpu.memory_space<vmem>>, vector<2x8xf32>,
    return
  }
  func.func @transform_0(%arg0: i32) -> (i32, i32) {
    %c0_i32 = arith.constant 0 : i32
    %c0_i32_0 = arith.constant 0 : i32
    return %arg0, %c0_i32 : i32, i32
  }
  func.func @transform_1(%arg0: i32) -> (i32, i32) {
    %c0_i32 = arith.constant 0 : i32
    %c0_i32_0 = arith.constant 0 : i32
    %c0_i32_1 = arith.constant 0 : i32
    return %c0_i32, %c0_i32_0 : i32, i32
  }
  func.func @transform_2(%arg0: i32) -> (i32, i32) {
    %c0_i32 = arith.constant 0 : i32
    %c0_i32_0 = arith.constant 0 : i32
    %c0_i32_1 = arith.constant 0 : i32
    return %c0_i32, %c0_i32_0 : i32, i32
  }
  func.func @transform_3(%arg0: i32) -> (i32, i32) {
    %c0_i32 = arith.constant 0 : i32
    %c0_i32_0 = arith.constant 0 : i32
    %c0_i32_1 = arith.constant 0 : i32
    return %c0_i32, %c0_i32_0 : i32, i32
  }
  func.func @transform_4(%arg0: i32) -> (i32, i32) {
    %c0_i32 = arith.constant 0 : i32
    %c0_i32_0 = arith.constant 0 : i32
    %c0_i32_1 = arith.constant 0 : i32
    return %c0_i32, %c0_i32_0 : i32, i32
  }
  func.func @transform_5(%arg0: i32) -> (i32, i32) {
    %c0_i32 = arith.constant 0 : i32
    %c0_i32_0 = arith.constant 0 : i32
    %c0_i32_1 = arith.constant 0 : i32
    return %c0_i32, %c0_i32_0 : i32, i32
  }
  func.func @transform_6(%arg0: i32) -> (i32, i32) {
    %c0_i32 = arith.constant 0 : i32
    %c0_i32_0 = arith.constant 0 : i32
    return %arg0, %c0_i32 : i32, i32
  }
}

</mosaic_0001>

<bundles_post_ra>
// kernel: three_layer_nn_with_skip.1
= control target key start
LH: loop header
LB: loop body
LE: loop exit
PB: predicated region body
PF: predicated region fallthrough
CT: control target
= control target key end

     0   :  { %vm31_vm0 = vcmask 130048   ;;  %s276_s0 = inlined_call_operand.vmem [shape: f32[2,16], index: 0, kind: input, shape index: {}]   ;;  %s277_s1 = inlined_call_operand.vmem [shape: f32[16,40], index: 1, kind: input, shape index: {}]   ;;  %s278_s2 = inlined_call_operand.vmem [shape: f32[1,40], index: 2, kind: input, shape index: {}]   ;;  %s279_s3 = inlined_call_operand.vmem [shape: f32[32,32], index: 3, kind: input, shape index: {}]   ;;  %s280_s4 = inlined_call_operand.vmem [shape: f32[1,32], index: 4, kind: input, shape index: {}]   ;;  %s281_s5 = inlined_call_operand.vmem [shape: f32[32,8], index: 5, kind: input, shape index: {}]   ;;  %s282_s6 = inlined_call_operand.hbm [shape: f32[2,8], index: 6, kind: output, shape index: {}]  }
   0x1   :  { %v26_v0 = vld [vmem:[%s277_s1 + $0x8] sm:$0xff]  ;;  %v25_v1 = vld [vmem:[%s277_s1] sm:$0xff]  ;;  %v59_v3 = vld [vmem:[%s279_s3 + $0x18] sm:$0xff] }
   0x2   :  { %49 = vmatpush.msra.mxu0 %v26_v0  ;;  %v24_v2 = vld [vmem:[%s276_s0] sm:$0x3]  ;;  %80 = vmatpush.msra.mxu1 %v59_v3 }
   0x3   :  { %11 = vsyncpa [#allocation3], 0  ;;  %v58_v4 = vld [vmem:[%s279_s3 + $0x10] sm:$0xff]  ;;  %v57_v5 = vld [vmem:[%s279_s3 + $0x8] sm:$0xff]  ;;  %vm64_vm1 = vcmask 261120   ;;  %s195_s11 = smov 96  }
   0x4   :  { %50 = vmatpush.msra.mxu0 %v25_v1  ;;  %81 = vmatpush.msra.mxu1 %v58_v4  ;;  %v56_v6 = vld [vmem:[%s279_s3] sm:$0xff]  ;;  %v92_v11 = vld [vmem:[%s281_s5 + $0x18] sm:$0xff]  ;;  %v91_v12 = vld [vmem:[%s281_s5 + $0x10] sm:$0xff]  ;;  %s148_s22 = sshll.u32 %s282_s6, 4  ;;  %vm139_vm5 = vcmask 58368   ;;  %s149_s22 = int_to_ptr.hbm [resolvable:$true] %s148_s22 }
   0x5   :  { %157 = vmatmul.msk.f32.vlgmr.msra.gmra.mxu0 %vm31_vm0, %v24_v2  ;;  %v163_v7 = vld [vmem:[%s278_s2] ss:$0 sm:$0xff]  ;;  %112 = vmatpush.msra.mxu2 %v92_v11  ;;  %v90_v13 = vld [vmem:[%s281_s5 + $0x8] sm:$0xff] }
   0x6   :  { %82 = vmatpush.msra.mxu1 %v57_v5  ;;  %v89_v14 = vld [vmem:[%s281_s5] sm:$0xff] }
   0x7   :  { %113 = vmatpush.msra.mxu2 %v91_v12  ;;  %v164_v15 = vld [vmem:[%s280_s4] ss:$0 sm:$0xff]  ;;  %s196_s4 = smov [#allocation2]  }
   0x8   :  { %83 = vmatpush.msra.mxu1 %v56_v6  ;;  %s146_s5 = sshll.u32 %s196_s4, 4  ;;  %s147_s5 = int_to_ptr.vmem [resolvable:$true] %s146_s5 }
   0x9   :  { %114 = vmatpush.msra.mxu2 %v90_v13 }
   0xb   :  { %115 = vmatpush.msra.mxu2 %v89_v14 }
  0x82   :  { %v52_v8 = vpop.f32.mrf.mxu0 }
  0x83   :  { %v53_v9 = vadd.f32 %v163_v7, %v52_v8 }
  0x85   :  { %v55_v10 = vmax.f32 %v53_v9, 0.0  ;;  %94 = vrot.lane.b32.xlu0 %v53_v9, %s195_s11 }
  0x87   :  { %158 = vmatmul.msk.f32.vlgmr.msra.gmra.mxu1 %vm64_vm1, %v55_v10 }
  0xf7   :  { %v95_v19 = vpop.permute.xlu0 %94 }
 0x104   :  { %v85_v16 = vpop.f32.mrf.mxu1 }
 0x105   :  { %v86_v17 = vadd.f32 %v164_v15, %v85_v16 }
 0x107   :  { %v88_v18 = vmax.f32 %v86_v17, 0.0 }
 0x109   :  { %159 = vmatmul.msk.f32.vlgmr.msra.gmra.mxu2 %vm64_vm1, %v88_v18 }
 0x18c   :  { %v117_v20 = vpop.f32.mrf.mxu2 }
 0x18d   :  { %v118_v21 = vadd.f32 %v117_v20, %v95_v19 }
 0x18f   :  { %v160_v22 = vmul.f32 -1.442695, %v118_v21 }
 0x191   :  { %165 = vpow2.f32 %v160_v22 }
 0x197   :  { %v166_v23 = vpop.eup %165 }
 0x198   :  { %v123_v24 = vadd.f32 1.0, %v166_v23 }
 0x19a   :  { %167 = vrcp.f32 %v123_v24  ;;  %v135_v28 = vand.u32 2147483648, %v123_v24  ;;  %v133_v30 = vand.u32 2147483647, %v123_v24  ;;  %vm129_vm3 = vweird.f32 %v123_v24 }
 0x19c   :  { %v136_v32 = vor.u32 1.1754944e-38, %v135_v28  ;;  %vm134_vm6 = vcmp.eq.f32.partialorder %v133_v30, 8.507059e+37 }
 0x1a0   :  { %v168_v25 = vpop.eup %167 }
 0x1a1   :  { %v125_v26 = vmul.f32 %v168_v25, %v123_v24  ;;  %vm130_vm2 = vweird.f32 %v168_v25 }
 0x1a2   :  { %vm131_vm4 = vmor %vm129_vm3, %vm130_vm2 }
 0x1a3   :  { %v126_v27 = vsub.f32 1.0, %v125_v26 }
 0x1a5   :  { %v127_v29 = vmul.f32 %v168_v25, %v126_v27 }
 0x1a7   :  { %v128_v31 = vadd.f32 %v168_v25, %v127_v29 }
 0x1a9   :  { %v132_v33 = vsel %vm131_vm4, %v168_v25, %v128_v31 }
 0x1aa   :  { %v137_v34 = vsel %vm134_vm6, %v136_v32, %v132_v33 }
 0x1ab   :  { %140 = vst.msk [vmem:[#allocation2] sm:$0x3] %vm139_vm5, %v137_v34 }
 0x1ac   :  { %151 = dma.vmem_to_hbm [thread:$0]  %s147_s5, 32, %s149_s22, [#allocation3]  }
 0x1ad   :  { %193 = dma.done.wait [#allocation3], 32  }
 0x1ae   :  { %194 = vsyncadd [#allocation3], 4294967264 }
 0x1af   :  { %156 = vsyncpa [#allocation3], 1 }

</bundles_post_ra>
